<compile_context>
chip_gen: v6e
topology: v6e:2x2x1
jax: 0.10.0
libtpu: 0.0.40
codegen_flags: <defaults>
</compile_context>

<pallas_src>
import jax
import jax.numpy as jnp
from jax.experimental import pallas as pl
from jax.experimental.pallas import tpu as pltpu


# ---------------------------------------------------------------------------
# Kernel
# ---------------------------------------------------------------------------
def _encoder_kernel(xlen_ref,             # SMEM (T,) int32   (scalar prefetch)
                    ecat_ref,             # VMEM (T, TN, 2H)  row t = [emb[t] | emb[T-1-t]]
                    wih_ref, whh_ref,     # VMEM (2H, 6H)     fused block-diagonal weights
                    bih_ref, bhh_ref,     # VMEM (1, 6H)
                    wout_ref, bout_ref,   # VMEM (2H, Lp), (1, Lp)   lane-padded
                    out_ref,              # VMEM (1, T, Lp)   per-N-block partial latent
                    gi_buf,               # VMEM (T, TN, 6H)  hoisted input projections
                    h_buf,                # VMEM (TN, 2H)     current fused hidden state
                    sel_buf):             # VMEM (T, 2H)      gathered last hidden states
    T, TN, H2 = ecat_ref.shape
    H = H2 // 2
    H4, H6 = 4 * H, 6 * H
    n_start = pl.program_id(0) * TN

    # 1) Hoisted input-gate matmul: both directions, all time steps, one matmul.
    e2 = ecat_ref[...].reshape(T * TN, H2)
    gi = jnp.dot(e2, wih_ref[...], preferred_element_type=jnp.float32) + bih_ref[...]
    gi_buf[...] = gi.reshape(T, TN, H6)

    whh = whh_ref[...]
    bhh = jnp.broadcast_to(bhh_ref[...], (TN, H6))        # hoisted broadcast

    # 2) Fused fwd+bwd recurrence with in-loop last-hidden extraction.
    #    Gate layout [r_f r_b | z_f z_b | n_f n_b];  h_cat = [h_f | h_b].
    def step(s, h_cat):
        gi_s = gi_buf[s]                                  # (TN, 6H)
        gh = jnp.dot(h_cat, whh, preferred_element_type=jnp.float32) + bhh
        rz = jax.nn.sigmoid(gi_s[:, :H4] + gh[:, :H4])    # (TN, 4H) in one pass
        r, z = rz[:, :H2], rz[:, H2:H4]
        n = jnp.tanh(gi_s[:, H4:] + r * gh[:, H4:])       # bias b_hn inside r*(.) as in torch
        h_new = (1.0 - z) * n + z * h_cat
        h_buf[...] = h_new                                # staged only for row extraction

        # Forward hidden of time s is needed at output row s, column x_len[s]-1.
        idx_f = xlen_ref[s] - 1 - n_start
        ok_f = jnp.logical_and(idx_f >= 0, idx_f < TN)
        row_f = h_buf[pl.ds(jnp.clip(idx_f, 0, TN - 1), 1), :]           # (1, 2H)
        sel_buf[pl.ds(s, 1), :H] = jnp.where(ok_f, row_f[:, :H], 0.0)

        # Backward hidden computed this step corresponds to time T-1-s; it is
        # needed at output row T-1-s, column x_len[T-1-s]-1.
        tb = T - 1 - s
        idx_b = xlen_ref[tb] - 1 - n_start
        ok_b = jnp.logical_and(idx_b >= 0, idx_b < TN)
        row_b = h_buf[pl.ds(jnp.clip(idx_b, 0, TN - 1), 1), :]           # (1, 2H)
        sel_buf[pl.ds(tb, 1), H:] = jnp.where(ok_b, row_b[:, H:], 0.0)
        return h_new

    jax.lax.fori_loop(0, T, step, jnp.zeros((TN, H2), jnp.float32), unroll=True)

    # 3) hidden2latent into a lane-padded slab.  Bias added by block 0 only;
    #    per-block partials are summed by the caller.
    bias_scale = (pl.program_id(0) == 0).astype(jnp.float32)
    out_ref[0] = (jnp.dot(sel_buf[...], wout_ref[...],
                          preferred_element_type=jnp.float32)
                  + bias_scale * bout_ref[...])


# ---------------------------------------------------------------------------
# Wrapper (embedding lookup + weight fusing are layout plumbing, done once)
# ---------------------------------------------------------------------------
def _fuse_dir_weights(w_f, w_b, H):
    """Block-diagonal, gate-interleaved weight (2*in, 6H): cols [r_f r_b|z_f z_b|n_f n_b]."""
    in_dim = w_f.shape[0]
    Z = jnp.zeros((in_dim, H), w_f.dtype)
    cols = []
    for k in range(3):
        sl = slice(k * H, (k + 1) * H)
        cols.append(jnp.concatenate([w_f[:, sl], Z], axis=0))   # forward gate k
        cols.append(jnp.concatenate([Z, w_b[:, sl]], axis=0))   # backward gate k
    return jnp.concatenate(cols, axis=1)                        # (2*in, 6H)


def _fuse_dir_bias(b_f, b_b, H):
    cols = []
    for k in range(3):
        sl = slice(k * H, (k + 1) * H)
        cols.append(b_f[:, sl])
        cols.append(b_b[:, sl])
    return jnp.concatenate(cols, axis=1)                        # (1, 6H)


def encoder_forward(x, x_len, params, *, tile_n=None):
    """Pallas-backed _ENCODER.forward.  x: (B, S) int32, x_len: (B,) int."""
    emb_table = params["embedding"]                              # (V, H)
    emb = jnp.take(emb_table, x, axis=0).astype(jnp.float32)     # (T, N, H); T=B, N=S
    T, N, H = emb.shape
    L = params["w_out"].shape[1]
    H2, H6 = 2 * H, 6 * H
    Lp = ((L + 127) // 128) * 128                                # lane-dense output slab

    # Fused bidirectional input: row t carries [emb[t] | emb[T-1-t]].
    ecat = jnp.concatenate([emb, emb[::-1]], axis=-1)            # (T, N, 2H)

    wih = _fuse_dir_weights(params["wih_f"], params["wih_b"], H)  # (2H, 6H)
    whh = _fuse_dir_weights(params["whh_f"], params["whh_b"], H)  # (2H, 6H)
    bih = _fuse_dir_bias(params["bih_f"], params["bih_b"], H)     # (1, 6H)
    bhh = _fuse_dir_bias(params["bhh_f"], params["bhh_b"], H)     # (1, 6H)

    w_out = jnp.pad(params["w_out"], ((0, 0), (0, Lp - L)))
    b_out = jnp.pad(params["b_out"], ((0, 0), (0, Lp - L)))

    if tile_n is None:
        tile_n = N if N <= 128 else 128
    assert N % tile_n == 0, "GRU batch axis must divide the N tile"
    grid_n = pl.cdiv(N, tile_n)

    grid_spec = pltpu.PrefetchScalarGridSpec(
        num_scalar_prefetch=1,
        grid=(grid_n,),
        in_specs=[
            pl.BlockSpec((T, tile_n, H2), lambda j, xl: (0, j, 0)),   # ecat: tiled over N
            pl.BlockSpec((H2, H6), lambda j, xl: (0, 0)),             # fused w_ih
            pl.BlockSpec((H2, H6), lambda j, xl: (0, 0)),             # fused w_hh
            pl.BlockSpec((1, H6), lambda j, xl: (0, 0)),              # fused b_ih
            pl.BlockSpec((1, H6), lambda j, xl: (0, 0)),              # fused b_hh
            pl.BlockSpec((H2, Lp), lambda j, xl: (0, 0)),             # w_out (padded)
            pl.BlockSpec((1, Lp), lambda j, xl: (0, 0)),              # b_out (padded)
        ],
        out_specs=pl.BlockSpec((1, T, Lp), lambda j, xl: (j, 0, 0)),
        scratch_shapes=[
            pltpu.VMEM((T, tile_n, H6), jnp.float32),   # hoisted input-gate projections
            pltpu.VMEM((tile_n, H2), jnp.float32),      # current fused [fwd | bwd] hidden
            pltpu.VMEM((T, H2), jnp.float32),           # gathered last hidden states
        ],
    )

    out = pl.pallas_call(
        _encoder_kernel,
        out_shape=jax.ShapeDtypeStruct((grid_n, T, Lp), jnp.float32),
        grid_spec=grid_spec,
        compiler_params=pltpu.CompilerParams(
            dimension_semantics=("parallel",)),   # N-blocks independent -> v7x 2 TCs
    )(x_len.astype(jnp.int32), ecat, wih, whh, bih, bhh, w_out, b_out)

    # Each output row is non-zero in exactly one N-block; sum partials and strip
    # the lane padding.
    res = out[0] if grid_n == 1 else out.sum(axis=0)
    return res[:, :L]


# ---------------------------------------------------------------------------
# Pure-JAX reference (same math) for a correctness check.
# ---------------------------------------------------------------------------
def _gru_cell_ref(x_t, h, w_ih, w_hh, b_ih, b_hh, H):
    gi = x_t @ w_ih + b_ih
    gh = h @ w_hh + b_hh
    r = jax.nn.sigmoid(gi[:, 0 * H:1 * H] + gh[:, 0 * H:1 * H])
    z = jax.nn.sigmoid(gi[:, 1 * H:2 * H] + gh[:, 1 * H:2 * H])
    n = jnp.tanh(gi[:, 2 * H:3 * H] + r * gh[:, 2 * H:3 * H])
    return (1.0 - z) * n + z * h


def encoder_reference(x, x_len, params):
    emb = jnp.take(params["embedding"], x, axis=0).astype(jnp.float32)  # (T, N, H)
    T, N, H = emb.shape

    def run_dir(w_ih, w_hh, b_ih, b_hh, reverse):
        seq = emb[::-1] if reverse else emb

        def step(h, x_t):
            h_new = _gru_cell_ref(x_t, h, w_ih, w_hh, b_ih, b_hh, H)
            return h_new, h_new

        _, outs = jax.lax.scan(step, jnp.zeros((N, H), jnp.float32), seq)
        return outs[::-1] if reverse else outs

    out_f = run_dir(params["wih_f"], params["whh_f"], params["bih_f"], params["bhh_f"], False)
    out_b = run_dir(params["wih_b"], params["whh_b"], params["bih_b"], params["bhh_b"], True)
    enc = jnp.concatenate([out_f, out_b], axis=-1)               # (T, N, 2H)
    last = enc[jnp.arange(T), x_len - 1, :]                      # (T, 2H)
    return last @ params["w_out"] + params["b_out"]


def init_params(key, vocab, hidden, latent):
    ks = jax.random.split(key, 12)
    kH = 1.0 / jnp.sqrt(hidden)
    kL = 1.0 / jnp.sqrt(2 * hidden)
    u = lambda k, shape, lim: jax.random.uniform(k, shape, jnp.float32, -lim, lim)
    return {
        "embedding": jax.random.normal(ks[0], (vocab, hidden), jnp.float32),
        # GRU weights stored pre-transposed: (in, 3H) / (H, 3H), gate order [r|z|n]
        "wih_f": u(ks[1], (hidden, 3 * hidden), kH),
        "whh_f": u(ks[2], (hidden, 3 * hidden), kH),
        "bih_f": u(ks[3], (1, 3 * hidden), kH),
        "bhh_f": u(ks[4], (1, 3 * hidden), kH),
        "wih_b": u(ks[5], (hidden, 3 * hidden), kH),
        "whh_b": u(ks[6], (hidden, 3 * hidden), kH),
        "bih_b": u(ks[7], (1, 3 * hidden), kH),
        "bhh_b": u(ks[8], (1, 3 * hidden), kH),
        "w_out": u(ks[9], (2 * hidden, latent), kL),
        "b_out": u(ks[10], (1, latent), kL),
    }


if __name__ == "__main__":
    VOCAB, HIDDEN, LATENT = 50, 32, 16
    B, S = 4, 8                       # B = GRU time axis, S = GRU "batch" axis

    key = jax.random.PRNGKey(0)
    kp, kx, kl = jax.random.split(key, 3)
    params = init_params(kp, VOCAB, HIDDEN, LATENT)

    x = jax.random.randint(kx, (B, S), 0, VOCAB, dtype=jnp.int32)
    x_len = jax.random.randint(kl, (B,), 1, S + 1, dtype=jnp.int32)

    latent = encoder_forward(x, x_len, params)
    jax.block_until_ready(latent)

    ref = encoder_reference(x, x_len, params)
    assert latent.shape == (B, LATENT)
    assert jnp.allclose(latent, ref, rtol=1e-4, atol=1e-4), "mismatch vs reference"

    print("KERNEL_OK")
</pallas_src>

<mosaic_0001>
module attributes {stable_mosaic.version = 11 : i64} {
  func.func @_encoder_kernel(%arg0: i32, %arg1: memref<4xi32, #tpu.memory_space<smem>>, %arg2: memref<4x8x64xf32, #tpu.memory_space<vmem>>, %arg3: memref<64x192xf32, #tpu.memory_space<vmem>>, %arg4: memref<64x192xf32, #tpu.memory_space<vmem>>, %arg5: memref<1x192xf32, #tpu.memory_space<vmem>>, %arg6: memref<1x192xf32, #tpu.memory_space<vmem>>, %arg7: memref<64x128xf32, #tpu.memory_space<vmem>>, %arg8: memref<1x128xf32, #tpu.memory_space<vmem>>, %arg9: memref<1x4x128xf32, #tpu.memory_space<vmem>>, %arg10: memref<4x8x192xf32, #tpu.memory_space<vmem>>, %arg11: memref<8x64xf32, #tpu.memory_space<vmem>>, %arg12: memref<4x64xf32, #tpu.memory_space<vmem>>) attributes {dimension_semantics = [#tpu.dimension_semantics<parallel>], iteration_bounds = array<i64: 1>, scalar_prefetch = 1 : i64, scratch_operands = 3 : i64, tpu.core_type = #tpu.core_type<tc>, window_params = [{transform_indices = @transform_0, window_bounds = array<i64: 4, 8, 64>}, {pipeline_mode = #tpu.pipeline_mode<synchronous>, transform_indices = @transform_1, window_bounds = array<i64: 64, 192>}, {pipeline_mode = #tpu.pipeline_mode<synchronous>, transform_indices = @transform_2, window_bounds = array<i64: 64, 192>}, {pipeline_mode = #tpu.pipeline_mode<synchronous>, transform_indices = @transform_3, window_bounds = array<i64: 1, 192>}, {pipeline_mode = #tpu.pipeline_mode<synchronous>, transform_indices = @transform_4, window_bounds = array<i64: 1, 192>}, {pipeline_mode = #tpu.pipeline_mode<synchronous>, transform_indices = @transform_5, window_bounds = array<i64: 64, 128>}, {pipeline_mode = #tpu.pipeline_mode<synchronous>, transform_indices = @transform_6, window_bounds = array<i64: 1, 128>}, {transform_indices = @transform_7, window_bounds = array<i64: 1, 4, 128>}]} {
    %c8_i32 = arith.constant 8 : i32
    %0 = arith.muli %arg0, %c8_i32 : i32
    %c0 = arith.constant 0 : index
    %c0_0 = arith.constant 0 : index
    %c0_1 = arith.constant 0 : index
    %1 = vector.load %arg2[%c0, %c0_0, %c0_1] : memref<4x8x64xf32, #tpu.memory_space<vmem>>, vector<4x8x64xf32>
    %2 = vector.shape_cast %1 : vector<4x8x64xf32> to vector<32x64xf32>
    %c0_2 = arith.constant 0 : index
    %c0_3 = arith.constant 0 : index
    %3 = vector.load %arg3[%c0_2, %c0_3] : memref<64x192xf32, #tpu.memory_space<vmem>>, vector<64x192xf32>
    %cst = arith.constant dense<0.000000e+00> : vector<32x192xf32>
    %4 = tpu.matmul %2, %3, %cst {dimension_numbers = #tpu.dot_dimension_numbers<[1], [0], [0], [1], [0, 0, 1, 1], [], []>} : vector<32x64xf32>, vector<64x192xf32>, vector<32x192xf32> -> vector<32x192xf32>
    %c0_4 = arith.constant 0 : index
    %c0_5 = arith.constant 0 : index
    %5 = vector.load %arg5[%c0_4, %c0_5] : memref<1x192xf32, #tpu.memory_space<vmem>>, vector<1x192xf32>
    %6 = vector.broadcast %5 : vector<1x192xf32> to vector<32x192xf32>
    %7 = arith.addf %4, %6 : vector<32x192xf32>
    %8 = vector.shape_cast %7 : vector<32x192xf32> to vector<4x8x192xf32>
    %c0_6 = arith.constant 0 : index
    %c0_7 = arith.constant 0 : index
    %c0_8 = arith.constant 0 : index
    %9 = vector.load %arg10[%c0_6, %c0_7, %c0_8] : memref<4x8x192xf32, #tpu.memory_space<vmem>>, vector<4x8x192xf32>
    tpu.vector_store %arg10[%c0_6, %c0_7, %c0_8], %8 {strides = array<i32>} : memref<4x8x192xf32, #tpu.memory_space<vmem>>, vector<4x8x192xf32>,
    %c0_9 = arith.constant 0 : index
    %c0_10 = arith.constant 0 : index
    %10 = vector.load %arg4[%c0_9, %c0_10] : memref<64x192xf32, #tpu.memory_space<vmem>>, vector<64x192xf32>
    %c0_11 = arith.constant 0 : index
    %c0_12 = arith.constant 0 : index
    %11 = vector.load %arg6[%c0_11, %c0_12] : memref<1x192xf32, #tpu.memory_space<vmem>>, vector<1x192xf32>
    %12 = vector.shape_cast %11 : vector<1x192xf32> to vector<1x192xf32>
    %13 = vector.broadcast %12 : vector<1x192xf32> to vector<8x192xf32>
    %cst_13 = arith.constant 0.000000e+00 : f32
    %14 = vector.broadcast %cst_13 : f32 to vector<8x64xf32>
    %c0_i32 = arith.constant 0 : i32
    %15 = arith.index_cast %c0_i32 : i32 to index
    %c0_14 = arith.constant 0 : index
    %c0_15 = arith.constant 0 : index
    %16 = vector.load %arg10[%15, %c0_14, %c0_15] : memref<4x8x192xf32, #tpu.memory_space<vmem>>, vector<1x8x192xf32>
    %17 = vector.shape_cast %16 : vector<1x8x192xf32> to vector<8x192xf32>
    %cst_16 = arith.constant dense<0.000000e+00> : vector<8x192xf32>
    %18 = tpu.matmul %14, %10, %cst_16 {dimension_numbers = #tpu.dot_dimension_numbers<[1], [0], [0], [1], [0, 0, 1, 1], [], []>} : vector<8x64xf32>, vector<64x192xf32>, vector<8x192xf32> -> vector<8x192xf32>
    %19 = arith.addf %18, %13 : vector<8x192xf32>
    %20 = vector.extract_strided_slice %17 {offsets = [0, 0], sizes = [8, 128], strides = [1, 1]} : vector<8x192xf32> to vector<8x128xf32>
    %21 = vector.extract_strided_slice %19 {offsets = [0, 0], sizes = [8, 128], strides = [1, 1]} : vector<8x192xf32> to vector<8x128xf32>
    %22 = arith.addf %20, %21 : vector<8x128xf32>
    %23 = arith.negf %22 : vector<8x128xf32>
    %24 = math.exp %23 : vector<8x128xf32>
    %cst_17 = arith.constant 1.000000e+00 : f32
    %25 = vector.broadcast %cst_17 : f32 to vector<8x128xf32>
    %26 = arith.addf %25, %24 : vector<8x128xf32>
    %27 = arith.divf %25, %26 : vector<8x128xf32>
    %28 = vector.extract_strided_slice %27 {offsets = [0, 0], sizes = [8, 64], strides = [1, 1]} : vector<8x128xf32> to vector<8x64xf32>
    %29 = vector.extract_strided_slice %27 {offsets = [0, 64], sizes = [8, 64], strides = [1, 1]} : vector<8x128xf32> to vector<8x64xf32>
    %30 = vector.extract_strided_slice %17 {offsets = [0, 128], sizes = [8, 64], strides = [1, 1]} : vector<8x192xf32> to vector<8x64xf32>
    %31 = vector.extract_strided_slice %19 {offsets = [0, 128], sizes = [8, 64], strides = [1, 1]} : vector<8x192xf32> to vector<8x64xf32>
    %32 = arith.mulf %28, %31 : vector<8x64xf32>
    %33 = arith.addf %30, %32 : vector<8x64xf32>
    %34 = math.tanh %33 : vector<8x64xf32>
    %cst_18 = arith.constant 1.000000e+00 : f32
    %35 = vector.broadcast %cst_18 : f32 to vector<8x64xf32>
    %36 = arith.subf %35, %29 : vector<8x64xf32>
    %37 = arith.mulf %36, %34 : vector<8x64xf32>
    %38 = arith.mulf %29, %14 : vector<8x64xf32>
    %39 = arith.addf %37, %38 : vector<8x64xf32>
    %c0_19 = arith.constant 0 : index
    %c0_20 = arith.constant 0 : index
    %40 = vector.load %arg11[%c0_19, %c0_20] : memref<8x64xf32, #tpu.memory_space<vmem>>, vector<8x64xf32>
    tpu.vector_store %arg11[%c0_19, %c0_20], %39 {strides = array<i32>} : memref<8x64xf32, #tpu.memory_space<vmem>>, vector<8x64xf32>,
    %41 = arith.index_cast %c0_i32 : i32 to index
    %42 = memref.load %arg1[%41] : memref<4xi32, #tpu.memory_space<smem>>
    %c1_i32 = arith.constant 1 : i32
    %43 = arith.subi %42, %c1_i32 : i32
    %44 = arith.subi %43, %0 : i32
    %c0_i32_21 = arith.constant 0 : i32
    %45 = arith.cmpi sge, %44, %c0_i32_21 : i32
    %c8_i32_22 = arith.constant 8 : i32
    %46 = arith.cmpi slt, %44, %c8_i32_22 : i32
    %47 = arith.andi %45, %46 : i1
    %c0_i32_23 = arith.constant 0 : i32
    %c7_i32 = arith.constant 7 : i32
    %48 = arith.maxsi %c0_i32_23, %44 : i32
    %49 = arith.minsi %c7_i32, %48 : i32
    %50 = arith.index_cast %49 : i32 to index
    %c0_24 = arith.constant 0 : index
    %51 = vector.load %arg11[%50, %c0_24] : memref<8x64xf32, #tpu.memory_space<vmem>>, vector<1x64xf32>
    %52 = vector.extract_strided_slice %51 {offsets = [0, 0], sizes = [1, 32], strides = [1, 1]} : vector<1x64xf32> to vector<1x32xf32>
    %cst_25 = arith.constant 0.000000e+00 : f32
    %53 = vector.broadcast %cst_25 : f32 to vector<1x32xf32>
    %54 = arith.select %47, %52, %53 : vector<1x32xf32>
    %55 = arith.index_cast %c0_i32 : i32 to index
    %c0_26 = arith.constant 0 : index
    %56 = vector.load %arg12[%55, %c0_26] : memref<4x64xf32, #tpu.memory_space<vmem>>, vector<1x32xf32>
    tpu.vector_store %arg12[%55, %c0_26], %54 {strides = array<i32>} : memref<4x64xf32, #tpu.memory_space<vmem>>, vector<1x32xf32>,
    %c3_i32 = arith.constant 3 : i32
    %57 = arith.subi %c3_i32, %c0_i32 : i32
    %58 = arith.index_cast %57 : i32 to index
    %59 = memref.load %arg1[%58] : memref<4xi32, #tpu.memory_space<smem>>
    %c1_i32_27 = arith.constant 1 : i32
    %60 = arith.subi %59, %c1_i32_27 : i32
    %61 = arith.subi %60, %0 : i32
    %c0_i32_28 = arith.constant 0 : i32
    %62 = arith.cmpi sge, %61, %c0_i32_28 : i32
    %c8_i32_29 = arith.constant 8 : i32
    %63 = arith.cmpi slt, %61, %c8_i32_29 : i32
    %64 = arith.andi %62, %63 : i1
    %c0_i32_30 = arith.constant 0 : i32
    %c7_i32_31 = arith.constant 7 : i32
    %65 = arith.maxsi %c0_i32_30, %61 : i32
    %66 = arith.minsi %c7_i32_31, %65 : i32
    %67 = arith.index_cast %66 : i32 to index
    %c0_32 = arith.constant 0 : index
    %68 = vector.load %arg11[%67, %c0_32] : memref<8x64xf32, #tpu.memory_space<vmem>>, vector<1x64xf32>
    %69 = vector.extract_strided_slice %68 {offsets = [0, 32], sizes = [1, 32], strides = [1, 1]} : vector<1x64xf32> to vector<1x32xf32>
    %cst_33 = arith.constant 0.000000e+00 : f32
    %70 = vector.broadcast %cst_33 : f32 to vector<1x32xf32>
    %71 = arith.select %64, %69, %70 : vector<1x32xf32>
    %72 = arith.index_cast %57 : i32 to index
    %c32 = arith.constant 32 : index
    %73 = vector.load %arg12[%72, %c32] : memref<4x64xf32, #tpu.memory_space<vmem>>, vector<1x32xf32>
    tpu.vector_store %arg12[%72, %c32], %71 {strides = array<i32>} : memref<4x64xf32, #tpu.memory_space<vmem>>, vector<1x32xf32>,
    %c1_i32_34 = arith.constant 1 : i32
    %74 = arith.index_cast %c1_i32_34 : i32 to index
    %c0_35 = arith.constant 0 : index
    %c0_36 = arith.constant 0 : index
    %75 = vector.load %arg10[%74, %c0_35, %c0_36] : memref<4x8x192xf32, #tpu.memory_space<vmem>>, vector<1x8x192xf32>
    %76 = vector.shape_cast %75 : vector<1x8x192xf32> to vector<8x192xf32>
    %cst_37 = arith.constant dense<0.000000e+00> : vector<8x192xf32>
    %77 = tpu.matmul %39, %10, %cst_37 {dimension_numbers = #tpu.dot_dimension_numbers<[1], [0], [0], [1], [0, 0, 1, 1], [], []>} : vector<8x64xf32>, vector<64x192xf32>, vector<8x192xf32> -> vector<8x192xf32>
    %78 = arith.addf %77, %13 : vector<8x192xf32>
    %79 = vector.extract_strided_slice %76 {offsets = [0, 0], sizes = [8, 128], strides = [1, 1]} : vector<8x192xf32> to vector<8x128xf32>
    %80 = vector.extract_strided_slice %78 {offsets = [0, 0], sizes = [8, 128], strides = [1, 1]} : vector<8x192xf32> to vector<8x128xf32>
    %81 = arith.addf %79, %80 : vector<8x128xf32>
    %82 = arith.negf %81 : vector<8x128xf32>
    %83 = math.exp %82 : vector<8x128xf32>
    %cst_38 = arith.constant 1.000000e+00 : f32
    %84 = vector.broadcast %cst_38 : f32 to vector<8x128xf32>
    %85 = arith.addf %84, %83 : vector<8x128xf32>
    %86 = arith.divf %84, %85 : vector<8x128xf32>
    %87 = vector.extract_strided_slice %86 {offsets = [0, 0], sizes = [8, 64], strides = [1, 1]} : vector<8x128xf32> to vector<8x64xf32>
    %88 = vector.extract_strided_slice %86 {offsets = [0, 64], sizes = [8, 64], strides = [1, 1]} : vector<8x128xf32> to vector<8x64xf32>
    %89 = vector.extract_strided_slice %76 {offsets = [0, 128], sizes = [8, 64], strides = [1, 1]} : vector<8x192xf32> to vector<8x64xf32>
    %90 = vector.extract_strided_slice %78 {offsets = [0, 128], sizes = [8, 64], strides = [1, 1]} : vector<8x192xf32> to vector<8x64xf32>
    %91 = arith.mulf %87, %90 : vector<8x64xf32>
    %92 = arith.addf %89, %91 : vector<8x64xf32>
    %93 = math.tanh %92 : vector<8x64xf32>
    %cst_39 = arith.constant 1.000000e+00 : f32
    %94 = vector.broadcast %cst_39 : f32 to vector<8x64xf32>
    %95 = arith.subf %94, %88 : vector<8x64xf32>
    %96 = arith.mulf %95, %93 : vector<8x64xf32>
    %97 = arith.mulf %88, %39 : vector<8x64xf32>
    %98 = arith.addf %96, %97 : vector<8x64xf32>
    %c0_40 = arith.constant 0 : index
    %c0_41 = arith.constant 0 : index
    %99 = vector.load %arg11[%c0_40, %c0_41] : memref<8x64xf32, #tpu.memory_space<vmem>>, vector<8x64xf32>
    tpu.vector_store %arg11[%c0_40, %c0_41], %98 {strides = array<i32>} : memref<8x64xf32, #tpu.memory_space<vmem>>, vector<8x64xf32>,
    %100 = arith.index_cast %c1_i32_34 : i32 to index
    %101 = memref.load %arg1[%100] : memref<4xi32, #tpu.memory_space<smem>>
    %c1_i32_42 = arith.constant 1 : i32
    %102 = arith.subi %101, %c1_i32_42 : i32
    %103 = arith.subi %102, %0 : i32
    %c0_i32_43 = arith.constant 0 : i32
    %104 = arith.cmpi sge, %103, %c0_i32_43 : i32
    %c8_i32_44 = arith.constant 8 : i32
    %105 = arith.cmpi slt, %103, %c8_i32_44 : i32
    %106 = arith.andi %104, %105 : i1
    %c0_i32_45 = arith.constant 0 : i32
    %c7_i32_46 = arith.constant 7 : i32
    %107 = arith.maxsi %c0_i32_45, %103 : i32
    %108 = arith.minsi %c7_i32_46, %107 : i32
    %109 = arith.index_cast %108 : i32 to index
    %c0_47 = arith.constant 0 : index
    %110 = vector.load %arg11[%109, %c0_47] : memref<8x64xf32, #tpu.memory_space<vmem>>, vector<1x64xf32>
    %111 = vector.extract_strided_slice %110 {offsets = [0, 0], sizes = [1, 32], strides = [1, 1]} : vector<1x64xf32> to vector<1x32xf32>
    %cst_48 = arith.constant 0.000000e+00 : f32
    %112 = vector.broadcast %cst_48 : f32 to vector<1x32xf32>
    %113 = arith.select %106, %111, %112 : vector<1x32xf32>
    %114 = arith.index_cast %c1_i32_34 : i32 to index
    %c0_49 = arith.constant 0 : index
    %115 = vector.load %arg12[%114, %c0_49] : memref<4x64xf32, #tpu.memory_space<vmem>>, vector<1x32xf32>
    tpu.vector_store %arg12[%114, %c0_49], %113 {strides = array<i32>} : memref<4x64xf32, #tpu.memory_space<vmem>>, vector<1x32xf32>,
    %c3_i32_50 = arith.constant 3 : i32
    %116 = arith.subi %c3_i32_50, %c1_i32_34 : i32
    %117 = arith.index_cast %116 : i32 to index
    %118 = memref.load %arg1[%117] : memref<4xi32, #tpu.memory_space<smem>>
    %c1_i32_51 = arith.constant 1 : i32
    %119 = arith.subi %118, %c1_i32_51 : i32
    %120 = arith.subi %119, %0 : i32
    %c0_i32_52 = arith.constant 0 : i32
    %121 = arith.cmpi sge, %120, %c0_i32_52 : i32
    %c8_i32_53 = arith.constant 8 : i32
    %122 = arith.cmpi slt, %120, %c8_i32_53 : i32
    %123 = arith.andi %121, %122 : i1
    %c0_i32_54 = arith.constant 0 : i32
    %c7_i32_55 = arith.constant 7 : i32
    %124 = arith.maxsi %c0_i32_54, %120 : i32
    %125 = arith.minsi %c7_i32_55, %124 : i32
    %126 = arith.index_cast %125 : i32 to index
    %c0_56 = arith.constant 0 : index
    %127 = vector.load %arg11[%126, %c0_56] : memref<8x64xf32, #tpu.memory_space<vmem>>, vector<1x64xf32>
    %128 = vector.extract_strided_slice %127 {offsets = [0, 32], sizes = [1, 32], strides = [1, 1]} : vector<1x64xf32> to vector<1x32xf32>
    %cst_57 = arith.constant 0.000000e+00 : f32
    %129 = vector.broadcast %cst_57 : f32 to vector<1x32xf32>
    %130 = arith.select %123, %128, %129 : vector<1x32xf32>
    %131 = arith.index_cast %116 : i32 to index
    %c32_58 = arith.constant 32 : index
    %132 = vector.load %arg12[%131, %c32_58] : memref<4x64xf32, #tpu.memory_space<vmem>>, vector<1x32xf32>
    tpu.vector_store %arg12[%131, %c32_58], %130 {strides = array<i32>} : memref<4x64xf32, #tpu.memory_space<vmem>>, vector<1x32xf32>,
    %c2_i32 = arith.constant 2 : i32
    %133 = arith.index_cast %c2_i32 : i32 to index
    %c0_59 = arith.constant 0 : index
    %c0_60 = arith.constant 0 : index
    %134 = vector.load %arg10[%133, %c0_59, %c0_60] : memref<4x8x192xf32, #tpu.memory_space<vmem>>, vector<1x8x192xf32>
    %135 = vector.shape_cast %134 : vector<1x8x192xf32> to vector<8x192xf32>
    %cst_61 = arith.constant dense<0.000000e+00> : vector<8x192xf32>
    %136 = tpu.matmul %98, %10, %cst_61 {dimension_numbers = #tpu.dot_dimension_numbers<[1], [0], [0], [1], [0, 0, 1, 1], [], []>} : vector<8x64xf32>, vector<64x192xf32>, vector<8x192xf32> -> vector<8x192xf32>
    %137 = arith.addf %136, %13 : vector<8x192xf32>
    %138 = vector.extract_strided_slice %135 {offsets = [0, 0], sizes = [8, 128], strides = [1, 1]} : vector<8x192xf32> to vector<8x128xf32>
    %139 = vector.extract_strided_slice %137 {offsets = [0, 0], sizes = [8, 128], strides = [1, 1]} : vector<8x192xf32> to vector<8x128xf32>
    %140 = arith.addf %138, %139 : vector<8x128xf32>
    %141 = arith.negf %140 : vector<8x128xf32>
    %142 = math.exp %141 : vector<8x128xf32>
    %cst_62 = arith.constant 1.000000e+00 : f32
    %143 = vector.broadcast %cst_62 : f32 to vector<8x128xf32>
    %144 = arith.addf %143, %142 : vector<8x128xf32>
    %145 = arith.divf %143, %144 : vector<8x128xf32>
    %146 = vector.extract_strided_slice %145 {offsets = [0, 0], sizes = [8, 64], strides = [1, 1]} : vector<8x128xf32> to vector<8x64xf32>
    %147 = vector.extract_strided_slice %145 {offsets = [0, 64], sizes = [8, 64], strides = [1, 1]} : vector<8x128xf32> to vector<8x64xf32>
    %148 = vector.extract_strided_slice %135 {offsets = [0, 128], sizes = [8, 64], strides = [1, 1]} : vector<8x192xf32> to vector<8x64xf32>
    %149 = vector.extract_strided_slice %137 {offsets = [0, 128], sizes = [8, 64], strides = [1, 1]} : vector<8x192xf32> to vector<8x64xf32>
    %150 = arith.mulf %146, %149 : vector<8x64xf32>
    %151 = arith.addf %148, %150 : vector<8x64xf32>
    %152 = math.tanh %151 : vector<8x64xf32>
    %cst_63 = arith.constant 1.000000e+00 : f32
    %153 = vector.broadcast %cst_63 : f32 to vector<8x64xf32>
    %154 = arith.subf %153, %147 : vector<8x64xf32>
    %155 = arith.mulf %154, %152 : vector<8x64xf32>
    %156 = arith.mulf %147, %98 : vector<8x64xf32>
    %157 = arith.addf %155, %156 : vector<8x64xf32>
    %c0_64 = arith.constant 0 : index
    %c0_65 = arith.constant 0 : index
    %158 = vector.load %arg11[%c0_64, %c0_65] : memref<8x64xf32, #tpu.memory_space<vmem>>, vector<8x64xf32>
    tpu.vector_store %arg11[%c0_64, %c0_65], %157 {strides = array<i32>} : memref<8x64xf32, #tpu.memory_space<vmem>>, vector<8x64xf32>,
    %159 = arith.index_cast %c2_i32 : i32 to index
    %160 = memref.load %arg1[%159] : memref<4xi32, #tpu.memory_space<smem>>
    %c1_i32_66 = arith.constant 1 : i32
    %161 = arith.subi %160, %c1_i32_66 : i32
    %162 = arith.subi %161, %0 : i32
    %c0_i32_67 = arith.constant 0 : i32
    %163 = arith.cmpi sge, %162, %c0_i32_67 : i32
    %c8_i32_68 = arith.constant 8 : i32
    %164 = arith.cmpi slt, %162, %c8_i32_68 : i32
    %165 = arith.andi %163, %164 : i1
    %c0_i32_69 = arith.constant 0 : i32
    %c7_i32_70 = arith.constant 7 : i32
    %166 = arith.maxsi %c0_i32_69, %162 : i32
    %167 = arith.minsi %c7_i32_70, %166 : i32
    %168 = arith.index_cast %167 : i32 to index
    %c0_71 = arith.constant 0 : index
    %169 = vector.load %arg11[%168, %c0_71] : memref<8x64xf32, #tpu.memory_space<vmem>>, vector<1x64xf32>
    %170 = vector.extract_strided_slice %169 {offsets = [0, 0], sizes = [1, 32], strides = [1, 1]} : vector<1x64xf32> to vector<1x32xf32>
    %cst_72 = arith.constant 0.000000e+00 : f32
    %171 = vector.broadcast %cst_72 : f32 to vector<1x32xf32>
    %172 = arith.select %165, %170, %171 : vector<1x32xf32>
    %173 = arith.index_cast %c2_i32 : i32 to index
    %c0_73 = arith.constant 0 : index
    %174 = vector.load %arg12[%173, %c0_73] : memref<4x64xf32, #tpu.memory_space<vmem>>, vector<1x32xf32>
    tpu.vector_store %arg12[%173, %c0_73], %172 {strides = array<i32>} : memref<4x64xf32, #tpu.memory_space<vmem>>, vector<1x32xf32>,
    %c3_i32_74 = arith.constant 3 : i32
    %175 = arith.subi %c3_i32_74, %c2_i32 : i32
    %176 = arith.index_cast %175 : i32 to index
    %177 = memref.load %arg1[%176] : memref<4xi32, #tpu.memory_space<smem>>
    %c1_i32_75 = arith.constant 1 : i32
    %178 = arith.subi %177, %c1_i32_75 : i32
    %179 = arith.subi %178, %0 : i32
    %c0_i32_76 = arith.constant 0 : i32
    %180 = arith.cmpi sge, %179, %c0_i32_76 : i32
    %c8_i32_77 = arith.constant 8 : i32
    %181 = arith.cmpi slt, %179, %c8_i32_77 : i32
    %182 = arith.andi %180, %181 : i1
    %c0_i32_78 = arith.constant 0 : i32
    %c7_i32_79 = arith.constant 7 : i32
    %183 = arith.maxsi %c0_i32_78, %179 : i32
    %184 = arith.minsi %c7_i32_79, %183 : i32
    %185 = arith.index_cast %184 : i32 to index
    %c0_80 = arith.constant 0 : index
    %186 = vector.load %arg11[%185, %c0_80] : memref<8x64xf32, #tpu.memory_space<vmem>>, vector<1x64xf32>
    %187 = vector.extract_strided_slice %186 {offsets = [0, 32], sizes = [1, 32], strides = [1, 1]} : vector<1x64xf32> to vector<1x32xf32>
    %cst_81 = arith.constant 0.000000e+00 : f32
    %188 = vector.broadcast %cst_81 : f32 to vector<1x32xf32>
    %189 = arith.select %182, %187, %188 : vector<1x32xf32>
    %190 = arith.index_cast %175 : i32 to index
    %c32_82 = arith.constant 32 : index
    %191 = vector.load %arg12[%190, %c32_82] : memref<4x64xf32, #tpu.memory_space<vmem>>, vector<1x32xf32>
    tpu.vector_store %arg12[%190, %c32_82], %189 {strides = array<i32>} : memref<4x64xf32, #tpu.memory_space<vmem>>, vector<1x32xf32>,
    %c3_i32_83 = arith.constant 3 : i32
    %192 = arith.index_cast %c3_i32_83 : i32 to index
    %c0_84 = arith.constant 0 : index
    %c0_85 = arith.constant 0 : index
    %193 = vector.load %arg10[%192, %c0_84, %c0_85] : memref<4x8x192xf32, #tpu.memory_space<vmem>>, vector<1x8x192xf32>
    %194 = vector.shape_cast %193 : vector<1x8x192xf32> to vector<8x192xf32>
    %cst_86 = arith.constant dense<0.000000e+00> : vector<8x192xf32>
    %195 = tpu.matmul %157, %10, %cst_86 {dimension_numbers = #tpu.dot_dimension_numbers<[1], [0], [0], [1], [0, 0, 1, 1], [], []>} : vector<8x64xf32>, vector<64x192xf32>, vector<8x192xf32> -> vector<8x192xf32>
    %196 = arith.addf %195, %13 : vector<8x192xf32>
    %197 = vector.extract_strided_slice %194 {offsets = [0, 0], sizes = [8, 128], strides = [1, 1]} : vector<8x192xf32> to vector<8x128xf32>
    %198 = vector.extract_strided_slice %196 {offsets = [0, 0], sizes = [8, 128], strides = [1, 1]} : vector<8x192xf32> to vector<8x128xf32>
    %199 = arith.addf %197, %198 : vector<8x128xf32>
    %200 = arith.negf %199 : vector<8x128xf32>
    %201 = math.exp %200 : vector<8x128xf32>
    %cst_87 = arith.constant 1.000000e+00 : f32
    %202 = vector.broadcast %cst_87 : f32 to vector<8x128xf32>
    %203 = arith.addf %202, %201 : vector<8x128xf32>
    %204 = arith.divf %202, %203 : vector<8x128xf32>
    %205 = vector.extract_strided_slice %204 {offsets = [0, 0], sizes = [8, 64], strides = [1, 1]} : vector<8x128xf32> to vector<8x64xf32>
    %206 = vector.extract_strided_slice %204 {offsets = [0, 64], sizes = [8, 64], strides = [1, 1]} : vector<8x128xf32> to vector<8x64xf32>
    %207 = vector.extract_strided_slice %194 {offsets = [0, 128], sizes = [8, 64], strides = [1, 1]} : vector<8x192xf32> to vector<8x64xf32>
    %208 = vector.extract_strided_slice %196 {offsets = [0, 128], sizes = [8, 64], strides = [1, 1]} : vector<8x192xf32> to vector<8x64xf32>
    %209 = arith.mulf %205, %208 : vector<8x64xf32>
    %210 = arith.addf %207, %209 : vector<8x64xf32>
    %211 = math.tanh %210 : vector<8x64xf32>
    %cst_88 = arith.constant 1.000000e+00 : f32
    %212 = vector.broadcast %cst_88 : f32 to vector<8x64xf32>
    %213 = arith.subf %212, %206 : vector<8x64xf32>
    %214 = arith.mulf %213, %211 : vector<8x64xf32>
    %215 = arith.mulf %206, %157 : vector<8x64xf32>
    %216 = arith.addf %214, %215 : vector<8x64xf32>
    %c0_89 = arith.constant 0 : index
    %c0_90 = arith.constant 0 : index
    %217 = vector.load %arg11[%c0_89, %c0_90] : memref<8x64xf32, #tpu.memory_space<vmem>>, vector<8x64xf32>
    tpu.vector_store %arg11[%c0_89, %c0_90], %216 {strides = array<i32>} : memref<8x64xf32, #tpu.memory_space<vmem>>, vector<8x64xf32>,
    %218 = arith.index_cast %c3_i32_83 : i32 to index
    %219 = memref.load %arg1[%218] : memref<4xi32, #tpu.memory_space<smem>>
    %c1_i32_91 = arith.constant 1 : i32
    %220 = arith.subi %219, %c1_i32_91 : i32
    %221 = arith.subi %220, %0 : i32
    %c0_i32_92 = arith.constant 0 : i32
    %222 = arith.cmpi sge, %221, %c0_i32_92 : i32
    %c8_i32_93 = arith.constant 8 : i32
    %223 = arith.cmpi slt, %221, %c8_i32_93 : i32
    %224 = arith.andi %222, %223 : i1
    %c0_i32_94 = arith.constant 0 : i32
    %c7_i32_95 = arith.constant 7 : i32
    %225 = arith.maxsi %c0_i32_94, %221 : i32
    %226 = arith.minsi %c7_i32_95, %225 : i32
    %227 = arith.index_cast %226 : i32 to index
    %c0_96 = arith.constant 0 : index
    %228 = vector.load %arg11[%227, %c0_96] : memref<8x64xf32, #tpu.memory_space<vmem>>, vector<1x64xf32>
    %229 = vector.extract_strided_slice %228 {offsets = [0, 0], sizes = [1, 32], strides = [1, 1]} : vector<1x64xf32> to vector<1x32xf32>
    %cst_97 = arith.constant 0.000000e+00 : f32
    %230 = vector.broadcast %cst_97 : f32 to vector<1x32xf32>
    %231 = arith.select %224, %229, %230 : vector<1x32xf32>
    %232 = arith.index_cast %c3_i32_83 : i32 to index
    %c0_98 = arith.constant 0 : index
    %233 = vector.load %arg12[%232, %c0_98] : memref<4x64xf32, #tpu.memory_space<vmem>>, vector<1x32xf32>
    tpu.vector_store %arg12[%232, %c0_98], %231 {strides = array<i32>} : memref<4x64xf32, #tpu.memory_space<vmem>>, vector<1x32xf32>,
    %c3_i32_99 = arith.constant 3 : i32
    %234 = arith.subi %c3_i32_99, %c3_i32_83 : i32
    %235 = arith.index_cast %234 : i32 to index
    %236 = memref.load %arg1[%235] : memref<4xi32, #tpu.memory_space<smem>>
    %c1_i32_100 = arith.constant 1 : i32
    %237 = arith.subi %236, %c1_i32_100 : i32
    %238 = arith.subi %237, %0 : i32
    %c0_i32_101 = arith.constant 0 : i32
    %239 = arith.cmpi sge, %238, %c0_i32_101 : i32
    %c8_i32_102 = arith.constant 8 : i32
    %240 = arith.cmpi slt, %238, %c8_i32_102 : i32
    %241 = arith.andi %239, %240 : i1
    %c0_i32_103 = arith.constant 0 : i32
    %c7_i32_104 = arith.constant 7 : i32
    %242 = arith.maxsi %c0_i32_103, %238 : i32
    %243 = arith.minsi %c7_i32_104, %242 : i32
    %244 = arith.index_cast %243 : i32 to index
    %c0_105 = arith.constant 0 : index
    %245 = vector.load %arg11[%244, %c0_105] : memref<8x64xf32, #tpu.memory_space<vmem>>, vector<1x64xf32>
    %246 = vector.extract_strided_slice %245 {offsets = [0, 32], sizes = [1, 32], strides = [1, 1]} : vector<1x64xf32> to vector<1x32xf32>
    %cst_106 = arith.constant 0.000000e+00 : f32
    %247 = vector.broadcast %cst_106 : f32 to vector<1x32xf32>
    %248 = arith.select %241, %246, %247 : vector<1x32xf32>
    %249 = arith.index_cast %234 : i32 to index
    %c32_107 = arith.constant 32 : index
    %250 = vector.load %arg12[%249, %c32_107] : memref<4x64xf32, #tpu.memory_space<vmem>>, vector<1x32xf32>
    tpu.vector_store %arg12[%249, %c32_107], %248 {strides = array<i32>} : memref<4x64xf32, #tpu.memory_space<vmem>>, vector<1x32xf32>,
    %c4_i32 = arith.constant 4 : i32
    %c0_i32_108 = arith.constant 0 : i32
    %251 = arith.cmpi eq, %arg0, %c0_i32_108 : i32
    %252 = arith.extui %251 : i1 to i32
    %253 = arith.sitofp %252 : i32 to f32
    %c0_109 = arith.constant 0 : index
    %c0_110 = arith.constant 0 : index
    %254 = vector.load %arg12[%c0_109, %c0_110] : memref<4x64xf32, #tpu.memory_space<vmem>>, vector<4x64xf32>
    %c0_111 = arith.constant 0 : index
    %c0_112 = arith.constant 0 : index
    %255 = vector.load %arg7[%c0_111, %c0_112] : memref<64x128xf32, #tpu.memory_space<vmem>>, vector<64x128xf32>
    %cst_113 = arith.constant dense<0.000000e+00> : vector<4x128xf32>
    %256 = tpu.matmul %254, %255, %cst_113 {dimension_numbers = #tpu.dot_dimension_numbers<[1], [0], [0], [1], [0, 0, 1, 1], [], []>} : vector<4x64xf32>, vector<64x128xf32>, vector<4x128xf32> -> vector<4x128xf32>
    %c0_114 = arith.constant 0 : index
    %c0_115 = arith.constant 0 : index
    %257 = vector.load %arg8[%c0_114, %c0_115] : memref<1x128xf32, #tpu.memory_space<vmem>>, vector<1x128xf32>
    %258 = vector.broadcast %253 : f32 to vector<1x128xf32>
    %259 = arith.mulf %258, %257 : vector<1x128xf32>
    %260 = vector.broadcast %259 : vector<1x128xf32> to vector<4x128xf32>
    %261 = arith.addf %256, %260 : vector<4x128xf32>
    %c0_116 = arith.constant 0 : index
    %c0_117 = arith.constant 0 : index
    %c0_118 = arith.constant 0 : index
    %262 = vector.load %arg9[%c0_116, %c0_117, %c0_118] : memref<1x4x128xf32, #tpu.memory_space<vmem>>, vector<1x4x128xf32>
    %263 = vector.shape_cast %262 : vector<1x4x128xf32> to vector<4x128xf32>
    %264 = vector.shape_cast %261 : vector<4x128xf32> to vector<1x4x128xf32>
    tpu.vector_store %arg9[%c0_116, %c0_117, %c0_118], %264 {strides = array<i32>} : memref<1x4x128xf32, #tpu.memory_space<vmem>>, vector<1x4x128xf32>,
    return
  }
  func.func @transform_0(%arg0: i32, %arg1: memref<4xi32, #tpu.memory_space<smem>>) -> (i32, i32, i32) {
    %c0_i32 = arith.constant 0 : i32
    %c0_i32_0 = arith.constant 0 : i32
    %c0_i32_1 = arith.constant 0 : i32
    return %c0_i32, %arg0, %c0_i32_0 : i32, i32, i32
  }
  func.func @transform_1(%arg0: i32, %arg1: memref<4xi32, #tpu.memory_space<smem>>) -> (i32, i32) {
    %c0_i32 = arith.constant 0 : i32
    %c0_i32_0 = arith.constant 0 : i32
    %c0_i32_1 = arith.constant 0 : i32
    return %c0_i32, %c0_i32_0 : i32, i32
  }
  func.func @transform_2(%arg0: i32, %arg1: memref<4xi32, #tpu.memory_space<smem>>) -> (i32, i32) {
    %c0_i32 = arith.constant 0 : i32
    %c0_i32_0 = arith.constant 0 : i32
    %c0_i32_1 = arith.constant 0 : i32
    return %c0_i32, %c0_i32_0 : i32, i32
  }
  func.func @transform_3(%arg0: i32, %arg1: memref<4xi32, #tpu.memory_space<smem>>) -> (i32, i32) {
    %c0_i32 = arith.constant 0 : i32
    %c0_i32_0 = arith.constant 0 : i32
    %c0_i32_1 = arith.constant 0 : i32
    return %c0_i32, %c0_i32_0 : i32, i32
  }
  func.func @transform_4(%arg0: i32, %arg1: memref<4xi32, #tpu.memory_space<smem>>) -> (i32, i32) {
    %c0_i32 = arith.constant 0 : i32
    %c0_i32_0 = arith.constant 0 : i32
    %c0_i32_1 = arith.constant 0 : i32
    return %c0_i32, %c0_i32_0 : i32, i32
  }
  func.func @transform_5(%arg0: i32, %arg1: memref<4xi32, #tpu.memory_space<smem>>) -> (i32, i32) {
    %c0_i32 = arith.constant 0 : i32
    %c0_i32_0 = arith.constant 0 : i32
    %c0_i32_1 = arith.constant 0 : i32
    return %c0_i32, %c0_i32_0 : i32, i32
  }
  func.func @transform_6(%arg0: i32, %arg1: memref<4xi32, #tpu.memory_space<smem>>) -> (i32, i32) {
    %c0_i32 = arith.constant 0 : i32
    %c0_i32_0 = arith.constant 0 : i32
    %c0_i32_1 = arith.constant 0 : i32
    return %c0_i32, %c0_i32_0 : i32, i32
  }
  func.func @transform_7(%arg0: i32, %arg1: memref<4xi32, #tpu.memory_space<smem>>) -> (i32, i32, i32) {
    %c0_i32 = arith.constant 0 : i32
    %c0_i32_0 = arith.constant 0 : i32
    %c0_i32_1 = arith.constant 0 : i32
    return %arg0, %c0_i32, %c0_i32_0 : i32, i32, i32
  }
}

</mosaic_0001>

<bundles_post_ra>
// kernel: tpu_custom_call.1
= control target key start
LH: loop header
LB: loop body
LE: loop exit
PB: predicated region body
PF: predicated region fallthrough
CT: control target
= control target key end

     0   :  { %s1194_s27 = smov [#allocation6]   ;;  %s1520_s0 = inlined_call_operand.hbm [shape: s32[4], index: 0, kind: input, shape index: {}]   ;;  %s1521_s1 = inlined_call_operand.hbm [shape: f32[4,8,64], index: 1, kind: input, shape index: {}]   ;;  %s1522_s2 = inlined_call_operand.hbm [shape: f32[64,192], index: 2, kind: input, shape index: {}]   ;;  %s1523_s3 = inlined_call_operand.hbm [shape: f32[64,192], index: 3, kind: input, shape index: {}]   ;;  %s1524_s4 = inlined_call_operand.vmem [shape: f32[1,192], index: 4, kind: input, shape index: {}]   ;;  %s1525_s5 = inlined_call_operand.vmem [shape: f32[1,192], index: 5, kind: input, shape index: {}]   ;;  %s1526_s6 = inlined_call_operand.hbm [shape: f32[64,128], index: 6, kind: input, shape index: {}]   ;;  %s1527_s7 = inlined_call_operand.vmem [shape: f32[1,128], index: 7, kind: input, shape index: {}]   ;;  %s1528_s8 = inlined_call_operand.hbm [shape: f32[1,4,128], index: 8, kind: output, shape index: {}]  }
   0x1   :  { %14 = dma.hbm_to_smem %s1520_s0, 16, %s1194_s27, [#allocation5] }
   0x2   :  { %1184 = dma.done.wait [#allocation5], 16 }
   0x3   :  { %1185 = vsyncadd [#allocation5], 4294967280 }
   0x4   :  { %16 = sfence }
   0x5   :  { %17 = vsyncpa [#allocation8], 0 }
   0x6   :  { %18 = vsyncpa [#allocation11], 0 }
   0x7   :  { %19 = vsyncpa [#allocation14], 0 }
   0x8   :  { %20 = vsyncpa [#allocation9], 0  ;;  %s1195_s30 = smov [#allocation10]  }
   0x9   :  { %s38_s9 = sshll.u32 %s1195_s30, 4  ;;  %s39_s9 = int_to_ptr.vmem [resolvable:$true] %s38_s9 }
   0xa   :  { %s1092_s10 = scalar_lea.vmem %s39_s9, 2048  ;;  %p1097_p1 = scmp.lt.s32.totalorder %s39_s9, %s39_s9 }
   0xb   :  { %p1093_p0 = scmp.ne.s32.totalorder %s39_s9, %s1092_s10  ;;  %p1098_p2 = scmp.lt.s32.totalorder %s1092_s10, %s1092_s10 }
   0xd   :  { %p1099_p3 = por %p1098_p2, %p1097_p1 }
   0xf   :  { %p1100_p4 = pnand %p1099_p3, %p1093_p0 }
  0x11   :  { %1103 = shalt.err (!%p1100_p4)
}
  0x12   :  { %s1196_s11 = smov 256   ;;  %s1197_s12 = smov 16  }
  0x13   :  { %44 = dma.hbm_to_vmem [thread:$0]  %s1522_s2, 2048, %s39_s9, [#allocation11], %s1196_s11, %s1196_s11, %s1197_s12  }
  0x14   :  { %s1198_s14 = smov [#allocation7]  }
  0x15   :  { %s26_s15 = sshll.u32 %s1198_s14, 4  ;;  %s27_s15 = int_to_ptr.vmem [resolvable:$true] %s26_s15 }
  0x16   :  { %s1112_s16 = scalar_lea.vmem %s27_s15, 512  ;;  %p1117_p6 = scmp.lt.s32.totalorder %s27_s15, %s27_s15 }
  0x17   :  { %p1113_p5 = scmp.ne.s32.totalorder %s27_s15, %s1112_s16  ;;  %p1118_p7 = scmp.lt.s32.totalorder %s1112_s16, %s1112_s16 }
  0x19   :  { %p1119_p8 = por %p1118_p7, %p1117_p6 }
  0x1b   :  { %p1120_p9 = pnand %p1119_p8, %p1113_p5 }
  0x1d   :  { %1123 = shalt.err (!%p1120_p9)
}
  0x1e   :  { %s1199_s17 = smov 128   ;;  %s1200_s18 = smov 8  }
  0x1f   :  { %32 = dma.hbm_to_vmem [thread:$0]  %s1521_s1, 512, %s27_s15, [#allocation8], %s1199_s17, %s1199_s17, %s1200_s18  }
  0x20   :  { %s1201_s21 = smov [#allocation12]   ;;  %s1202_s23 = smov [#allocation13]  }
  0x21   :  { %s50_s22 = sshll.u32 %s1201_s21, 4  ;;  %s66_s2 = sshll.u32 %s1202_s23, 4  ;;  %s51_s22 = int_to_ptr.vmem [resolvable:$true] %s50_s22  ;;  %s67_s2 = int_to_ptr.vmem [resolvable:$true] %s66_s2 }
  0x22   :  { %s1132_s24 = scalar_lea.vmem %s51_s22, 2048  ;;  %p1137_p11 = scmp.lt.s32.totalorder %s51_s22, %s51_s22 }
  0x23   :  { %p1133_p10 = scmp.ne.s32.totalorder %s51_s22, %s1132_s24  ;;  %p1138_p12 = scmp.lt.s32.totalorder %s1132_s24, %s1132_s24 }
  0x25   :  { %p1139_p13 = por %p1138_p12, %p1137_p11 }
  0x27   :  { %p1140_p0 = pnand %p1139_p13, %p1133_p10 }
  0x29   :  { %1143 = shalt.err (!%p1140_p0)
}
  0x2a   :  { %56 = dma.hbm_to_vmem [thread:$0]  %s1523_s3, 2048, %s51_s22, [#allocation11], %s1196_s11, %s1196_s11, %s1197_s12  }
  0x2b   :  { %s1152_s1 = scalar_lea.vmem %s67_s2, 1024  ;;  %p1157_p2 = scmp.lt.s32.totalorder %s67_s2, %s67_s2 }
  0x2c   :  { %p1153_p1 = scmp.ne.s32.totalorder %s67_s2, %s1152_s1  ;;  %p1158_p3 = scmp.lt.s32.totalorder %s1152_s1, %s1152_s1 }
  0x2e   :  { %p1159_p4 = por %p1158_p3, %p1157_p2 }
  0x30   :  { %p1160_p5 = pnand %p1159_p4, %p1153_p1 }
  0x32   :  { %1163 = shalt.err (!%p1160_p5)
}
  0x33   :  { %72 = dma.hbm_to_vmem [thread:$0]  %s1526_s6, 1024, %s67_s2, [#allocation14], %s1199_s17, %s1199_s17, %s1200_s18  }
  0x34   :  { %1186 = dma.done.wait [#allocation8], 512  }
  0x35   :  { %1187 = vsyncadd [#allocation8], 4294966784 }
  0x36   :  { %1188 = dma.done.wait [#allocation11], 4096  }
  0x37   :  { %1189 = vsyncadd [#allocation11], 4294963200 }
  0x38   :  { %1190 = dma.done.wait [#allocation14], 1024  }
  0x39   :  { %1191 = vsyncadd [#allocation14], 4294966272  ;;  %v1203_v0 = vmov 0.0   ;;  %v107_v1 = vld [vmem:[#allocation10 + $0x78] sm:$0xff]  ;;  %v106_v2 = vld [vmem:[#allocation10 + $0x70] sm:$0xff]  ;;  %vm120_vm0 = vcmask 523264   ;;  %v110_v34 = vlaneseq }
  0x3a   :  { %197 = vmatprep.mubr.f32.mxu0 %v1203_v0  ;;  %327 = vmatprep.mubr.f32.mxu1 %v1203_v0  ;;  %v105_v3 = vld [vmem:[#allocation10 + $0x68] sm:$0xff]  ;;  %v104_v4 = vld [vmem:[#allocation10 + $0x60] sm:$0xff]  ;;  %v103_v5 = vld [vmem:[#allocation10 + $0x58] sm:$0xff]  ;;  %s932_s9 = sld [smem:[#allocation6 + $0x3]]  ;;  %vm374_vm3 = vcmask 253952   ;;  %vm393_vm4 = vcmask 516352  }
  0x3b   :  { %149 = vmatprep.subr.mxu0 %v107_v1  ;;  %v1275_v6 = vld [vmem:[#allocation12 + $0x78] sm:$0xff]  ;;  %v102_v7 = vld [vmem:[#allocation10 + $0x50] sm:$0xff]  ;;  %v1280_v9 = vld [vmem:[#allocation12 + $0x68] sm:$0xff]  ;;  %v111_v35 = vshrl.u32 %v110_v34, 7  ;;  %s942_s18 = sld [smem:[#allocation6 + $0x1]]  ;;  %vm1205_vm7 = vmmov 0  }
  0x3c   :  { %150 = vmatpush1.msra.mxu0 %v106_v2  ;;  %279 = vmatprep.subr.mxu1 %v1275_v6  ;;  %v1278_v8 = vld [vmem:[#allocation12 + $0x70] sm:$0xff]  ;;  %v101_v10 = vld [vmem:[#allocation10 + $0x48] sm:$0xff]  ;;  %v1283_v11 = vld [vmem:[#allocation12 + $0x60] sm:$0xff]  ;;  %s950_s19 = sld [smem:[#allocation6 + $0x2]]  ;;  %s1206_s28 = smov [#allocation15]  }
  0x3d   :  { %151 = vmatprep.subr.mxu0 %v105_v3  ;;  %280 = vmatpush1.msra.mxu1 %v1278_v8  ;;  %v100_v12 = vld [vmem:[#allocation10 + $0x40] sm:$0xff]  ;;  %v1286_v13 = vld [vmem:[#allocation12 + $0x58] sm:$0xff]  ;;  %v1288_v14 = vld [vmem:[#allocation12 + $0x50] sm:$0xff]  ;;  %v112_v36 = vsub.s32 0, %v111_v35  ;;  %v116_v38 = vsub.s32 1, %v111_v35  ;;  %s901_s3 = sshll.u32 %s1206_s28, 4  ;;  %s902_s3 = int_to_ptr.vmem [resolvable:$true] %s901_s3 }
  0x3e   :  { %152 = vmatpush1.msra.mxu0 %v104_v4  ;;  %281 = vmatprep.subr.mxu1 %v1280_v9  ;;  %v99_v15 = vld [vmem:[#allocation10 + $0x38] sm:$0xff]  ;;  %v1291_v16 = vld [vmem:[#allocation12 + $0x48] sm:$0xff]  ;;  %v98_v17 = vld [vmem:[#allocation10 + $0x30] sm:$0xff]  ;;  %s1164_s6 = scalar_lea.vmem %s902_s3, 64 }
  0x3f   :  { %153 = vmatprep.subr.mxu0 %v103_v5  ;;  %282 = vmatpush1.msra.mxu1 %v1283_v11  ;;  %v1294_v18 = vld [vmem:[#allocation12 + $0x40] sm:$0xff]  ;;  %v97_v19 = vld [vmem:[#allocation10 + $0x28] sm:$0xff]  ;;  %v1297_v20 = vld [vmem:[#allocation12 + $0x38] sm:$0xff] }
  0x40   :  { %154 = vmatpush1.msra.mxu0 %v102_v7  ;;  %283 = vmatprep.subr.mxu1 %v1286_v13  ;;  %v96_v21 = vld [vmem:[#allocation10 + $0x20] sm:$0xff]  ;;  %v1300_v22 = vld [vmem:[#allocation12 + $0x30] sm:$0xff]  ;;  %v95_v23 = vld [vmem:[#allocation10 + $0x18] sm:$0xff]  ;;  %s933_s11 = sadd.s32 4294967295, %s932_s9 }
  0x41   :  { %155 = vmatprep.subr.mxu0 %v101_v10  ;;  %284 = vmatpush1.msra.mxu1 %v1288_v14  ;;  %v1303_v24 = vld [vmem:[#allocation12 + $0x28] sm:$0xff]  ;;  %v94_v25 = vld [vmem:[#allocation10 + $0x10] sm:$0xff]  ;;  %v1306_v26 = vld [vmem:[#allocation12 + $0x20] sm:$0xff]  ;;  %p379_p9 = scmp.ge.s32.totalorder %s933_s11, 0  ;;  %p380_p10 = scmp.lt.s32.totalorder %s933_s11, 8 }
  0x42   :  { %156 = vmatpush1.msra.mxu0 %v100_v12  ;;  %285 = vmatprep.subr.mxu1 %v1291_v16  ;;  %v93_v27 = vld [vmem:[#allocation10 + $0x8] sm:$0xff]  ;;  %v1309_v28 = vld [vmem:[#allocation12 + $0x18] sm:$0xff]  ;;  %v92_v29 = vld [vmem:[#allocation10] sm:$0xff]  ;;  %p383_p12 = scmp.gt.s32.totalorder %s933_s11, 0  ;;  %p934_p1 = scmp.lt.s32.totalorder %s933_s11, 7 }
  0x43   :  { %157 = vmatprep.subr.mxu0 %v99_v15  ;;  %286 = vmatpush1.msra.mxu1 %v1294_v18  ;;  %v1312_v30 = vld [vmem:[#allocation12 + $0x10] sm:$0xff]  ;;  %v88_v31 = vld [vmem:[#allocation7] sm:$0xff]  ;;  %v1315_v32 = vld [vmem:[#allocation12 + $0x8] sm:$0xff]  ;;  %p1398_p13 = pnand %p380_p10, %p379_p9  ;;  %s943_s20 = sadd.s32 4294967295, %s942_s18 }
  0x44   :  { %158 = vmatpush1.msra.mxu0 %v98_v17  ;;  %287 = vmatprep.subr.mxu1 %v1297_v20  ;;  %v1318_v33 = vld [vmem:[#allocation12] sm:$0xff]  ;;  %v108_v37 = vld [vmem:[%s1524_s4] sm:$0x3]  ;;  %v89_v60 = vld [vmem:[#allocation7 + $0x8] sm:$0xff]  ;;  %s1204_s4 = smov 64   ;;  %s1533_s11 = smov (!%p383_p12, %s933_s11), 0 }
  0x45   :  { %159 = vmatprep.subr.mxu0 %v97_v19  ;;  %288 = vmatpush1.msra.mxu1 %v1300_v22  ;;  %v246_v39 = vld [vmem:[%s1525_s5] sm:$0x3]  ;;  %v113_v40 = vrot.slane %v108_v37, %v112_v36  ;;  %v117_v41 = vrot.slane %v108_v37, %v116_v38  ;;  %v91_v62 = vld [vmem:[#allocation7 + $0x18] sm:$0xff]  ;;  %s357_s5 = sld [smem:[#allocation6]]  ;;  %s1537_s11 = smov (!%p934_p1, %s1533_s11), 7 }
  0x46   :  { %160 = vmatpush1.msra.mxu0 %v96_v21  ;;  %289 = vmatprep.subr.mxu1 %v1303_v24  ;;  %v1367_v42 = vrot.slane %v246_v39, %v112_v36  ;;  %v1371_v53 = vrot.slane %v246_v39, %v116_v38  ;;  %v90_v61 = vld [vmem:[#allocation7 + $0x10] sm:$0xff]  ;;  %s939_s15 = scalar_select %p1398_p13, 0, 1 }
  0x47   :  { %161 = vmatprep.subr.mxu0 %v95_v23  ;;  %290 = vmatpush1.msra.mxu1 %v1306_v26  ;;  %s387_s17 = scalar_lea.vmem [#allocation3], %s1537_s11  ;;  %s951_s21 = sadd.s32 4294967295, %s950_s19 }
  0x48   :  { %162 = vmatpush1.msra.mxu0 %v94_v25  ;;  %291 = vmatprep.subr.mxu1 %v1309_v28  ;;  %v1416_v35 = vstv %s939_s15  ;;  %p497_p2 = scmp.ge.s32.totalorder %s943_s20, 0  ;;  %p498_p3 = scmp.lt.s32.totalorder %s943_s20, 8 }
  0x49   :  { %163 = vmatprep.subr.mxu0 %v93_v27  ;;  %292 = vmatpush1.msra.mxu1 %v1312_v30  ;;  %vm391_vm2 = vcmp.eq.s32.totalorder %v1416_v35, 1  ;;  %p501_p4 = scmp.gt.s32.totalorder %s943_s20, 0  ;;  %p515_p5 = scmp.ge.s32.totalorder %s951_s21, 0 }
  0x4a   :  { %164 = vmatpush1.msra.mxu0 %v92_v29  ;;  %293 = vmatprep.subr.mxu1 %v1315_v32  ;;  %p944_p10 = scmp.lt.s32.totalorder %s943_s20, 7  ;;  %p1165_p12 = scmp.ne.s32.totalorder %s902_s3, %s1164_s6 }
  0x4b   :  { %920 = vmatmul.mubr.msk.f32.vlgmr.msra.gmra.mxu0 %vm120_vm0, %v88_v31  ;;  %294 = vmatpush1.msra.mxu1 %v1318_v33  ;;  %s925_s10 = sadd.s32 4294967295, %s357_s5  ;;  %p1169_p13 = scmp.lt.s32.totalorder %s902_s3, %s902_s3 }
  0x4c   :  { %416 = vmatprep.subr.mxu0 %v1275_v6  ;;  %328 = vmatmul.mubr.f32.vlgmr.msra.gmra.mxu1 %v1203_v0  ;;  %p360_p6 = scmp.ge.s32.totalorder %s925_s10, 0  ;;  %p361_p7 = scmp.lt.s32.totalorder %s925_s10, 8 }
  0x4d   :  { %417 = vmatpush1.msra.mxu0 %v1278_v8  ;;  %203 = vmatprep.mubr.f32.mxu0 %v1203_v0  ;;  %p364_p8 = scmp.gt.s32.totalorder %s925_s10, 0  ;;  %p926_p0 = scmp.lt.s32.totalorder %s925_s10, 7 }
  0x4e   :  { %418 = vmatprep.subr.mxu0 %v1280_v9  ;;  %551 = vmatprep.subr.mxu1 %v1275_v6  ;;  %p1394_p11 = pnand %p361_p7, %p360_p6  ;;  %p516_p6 = scmp.lt.s32.totalorder %s951_s21, 8 }
  0x4f   :  { %419 = vmatpush1.msra.mxu0 %v1283_v11  ;;  %552 = vmatpush1.msra.mxu1 %v1278_v8  ;;  %s365_s0 = scalar_select %p364_p8, %s925_s10, 0 }
  0x50   :  { %420 = vmatprep.subr.mxu0 %v1286_v13  ;;  %553 = vmatprep.subr.mxu1 %v1280_v9  ;;  %s931_s14 = scalar_select %p1394_p11, 0, 1 }
  0x51   :  { %421 = vmatpush1.msra.mxu0 %v1288_v14  ;;  %554 = vmatpush1.msra.mxu1 %v1283_v11  ;;  %s1535_s0 = smov (!%p926_p0, %s365_s0), 7  ;;  %p1452_p7 = pnand %p498_p3, %p497_p2 }
  0x52   :  { %422 = vmatprep.subr.mxu0 %v1291_v16  ;;  %555 = vmatprep.subr.mxu1 %v1286_v13  ;;  %v1414_v34 = vstv %s931_s14  ;;  %s368_s16 = scalar_lea.vmem [#allocation3], %s1535_s0  ;;  %p519_p8 = scmp.gt.s32.totalorder %s951_s21, 0 }
  0x53   :  { %423 = vmatpush1.msra.mxu0 %v1294_v18  ;;  %556 = vmatpush1.msra.mxu1 %v1288_v14  ;;  %vm372_vm1 = vcmp.eq.s32.totalorder %v1414_v34, 1  ;;  %s502_s23 = scalar_select %p501_p4, %s943_s20, 0 }
  0x54   :  { %424 = vmatprep.subr.mxu0 %v1297_v20  ;;  %557 = vmatprep.subr.mxu1 %v1291_v16  ;;  %p517_p9 = pnand %p516_p6, %p515_p5  ;;  %p952_p11 = scmp.lt.s32.totalorder %s951_s21, 7 }
  0x55   :  { %425 = vmatpush1.msra.mxu0 %v1300_v22  ;;  %558 = vmatpush1.msra.mxu1 %v1294_v18  ;;  %s1539_s21 = smov (!%p519_p8, %s951_s21), 0  ;;  %s1541_s23 = smov (!%p944_p10, %s502_s23), 7 }
  0x56   :  { %426 = vmatprep.subr.mxu0 %v1303_v24  ;;  %559 = vmatprep.subr.mxu1 %v1297_v20  ;;  %s949_s2 = scalar_select %p1452_p7, 0, 1 }
  0x57   :  { %427 = vmatpush1.msra.mxu0 %v1306_v26  ;;  %560 = vmatpush1.msra.mxu1 %v1300_v22  ;;  %s957_s24 = scalar_select %p517_p9, 0, 1 }
  0x58   :  { %428 = vmatprep.subr.mxu0 %v1309_v28  ;;  %561 = vmatprep.subr.mxu1 %v1303_v24  ;;  %s1543_s21 = smov (!%p952_p11, %s1539_s21), 7  ;;  %s505_s25 = scalar_lea.vmem [#allocation3], %s1541_s23 }
  0x59   :  { %429 = vmatpush1.msra.mxu0 %v1312_v30  ;;  %562 = vmatpush1.msra.mxu1 %v1306_v26  ;;  %s523_s26 = scalar_lea.vmem [#allocation3], %s1543_s21  ;;  %p1170_p0 = scmp.lt.s32.totalorder %s1164_s6, %s1164_s6 }
  0x5a   :  { %430 = vmatprep.subr.mxu0 %v1315_v32  ;;  %563 = vmatprep.subr.mxu1 %v1309_v28 }
  0x5b   :  { %431 = vmatpush1.msra.mxu0 %v1318_v33  ;;  %564 = vmatpush1.msra.mxu1 %v1312_v30  ;;  %p1171_p1 = por %p1170_p0, %p1169_p13 }
  0x5c   :  { %599 = vmatprep.mubr.f32.mxu1 %v1203_v0  ;;  %565 = vmatprep.subr.mxu1 %v1315_v32 }
  0x5d   :  { %686 = vmatprep.subr.mxu0 %v1275_v6  ;;  %566 = vmatpush1.msra.mxu1 %v1318_v33  ;;  %p1172_p2 = pnand %p1171_p1, %p1165_p12 }
  0x5e   :  { %1020 = vmatprep.subr.mxu1 %v1203_v0  ;;  %921 = vmatmul.mubr.msk.f32.gmra.mxu0 %vm120_vm0, %v89_v60 }
  0x5f   :  { %209 = vmatprep.mubr.f32.mxu0 %v1203_v0 }
  0x62   :  { %922 = vmatmul.mubr.msk.f32.gmra.mxu0 %vm120_vm0, %v90_v61 }
  0x63   :  { %215 = vmatprep.mubr.f32.mxu0 %v1203_v0 }
  0x66   :  { %923 = vmatmul.mubr.msk.f32.gmra.mxu0 %vm120_vm0, %v91_v62 }
  0x67   :  { %464 = vmatprep.mubr.f32.mxu0 %v1203_v0 }
 0x10b   :  { %v199_v43 = vpop.f32.mrf.mxu0 }
 0x10c   :  { %v200_v44 = vadd.f32 %v199_v43, %v113_v40  ;;  %v329_v46 = vpop.f32.mrf.mxu1 }
 0x10d   :  { %v201_v45 = vpop.f32.mrf.mxu0  ;;  %v330_v48 = vadd.f32 %v329_v46, %v1367_v42  ;;  %v526_v46 = vstv %s957_s24 }
 0x10e   :  { %v202_v47 = vadd.f32 %v201_v45, %v117_v41  ;;  %v331_v54 = vpop.f32.mrf.mxu1  ;;  %v508_v45 = vstv %s949_s2  ;;  %vm527_vm6 = vcmp.eq.s32.totalorder %v526_v46, 1 }
 0x10f   :  { %v334_v49 = vadd.f32 %v330_v48, %v200_v44  ;;  %v332_v55 = vadd.f32 %v331_v54, %v1371_v53  ;;  %vm509_vm5 = vcmp.eq.s32.totalorder %v508_v45, 1 }
 0x110   :  { %223 = vst.msk [vmem:[#allocation2 + $0x8] sm:$0xff] %vm120_vm0, %v202_v47 }
 0x111   :  { %v924_v50 = vmul.f32 -1.442695, %v334_v49 }
 0x113   :  { %1052 = vpow2.f32 %v924_v50 }
 0x117   :  { %v259_v58 = vld [vmem:[#allocation2 + $0x8] sm:$0xff] }
 0x11e   :  { %v205_v6 = vpop.f32.mrf.mxu0 }
 0x11f   :  { %v1385_v7 = vadd.f32 %v205_v6, %v113_v40 }
 0x120   :  { %v1053_v51 = vpop.eup %1052  ;;  %v207_v10 = vpop.f32.mrf.mxu0 }
 0x121   :  { %v338_v52 = vadd.f32 1.0, %v1053_v51  ;;  %v208_v12 = vadd.f32 %v207_v10, %v117_v41 }
 0x122   :  { %v211_v15 = vpop.f32.mrf.mxu0 }
 0x123   :  { %1054 = vrcp.f32 %v338_v52  ;;  %225 = vst.msk [vmem:[#allocation2 + $0x18] sm:$0xff] %vm120_vm0, %v208_v12  ;;  %v1388_v17 = vadd.f32 %v211_v15, %v113_v40 }
 0x124   :  { %v213_v19 = vpop.f32.mrf.mxu0 }
 0x125   :  { %v214_v21 = vadd.f32 %v213_v19, %v117_v41 }
 0x126   :  { %v217_v23 = vpop.f32.mrf.mxu0 }
 0x127   :  { %227 = vst.msk [vmem:[#allocation2 + $0x28] sm:$0xff] %vm120_vm0, %v214_v21  ;;  %v1391_v25 = vadd.f32 %v217_v23, %v113_v40 }
 0x128   :  { %v219_v27 = vpop.f32.mrf.mxu0 }
 0x129   :  { %v220_v29 = vadd.f32 %v219_v27, %v117_v41 }
 0x12b   :  { %229 = vst.msk [vmem:[#allocation2 + $0x38] sm:$0xff] %vm120_vm0, %v220_v29 }
 0x12e   :  { %v532_v62 = vld [vmem:[#allocation2 + $0x28] sm:$0xff] }
 0x130   :  { %v1055_v56 = vpop.eup %1054 }
 0x131   :  { %v341_v57 = vmul.f32 %v1055_v56, %v332_v55  ;;  %v344_v1 = vsub.f32 1.0, %v1055_v56  ;;  %v350_v3 = vmul.f32 0.0, %v1055_v56 }
 0x133   :  { %v342_v59 = vadd.f32 %v341_v57, %v259_v58 }
 0x135   :  { %1056 = vtanh.f32 %v342_v59 }
 0x142   :  { %v1057_v63 = vpop.eup %1056 }
 0x143   :  { %346 = vrot.lane.b32.xlu0 %v1057_v63, %s1204_s4 }
 0x1b5   :  { %v347_v2 = vpop.permute.xlu0 %346 }
 0x1b6   :  { %v349_v4 = vmul.f32 %v347_v2, %v344_v1 }
 0x1b8   :  { %v1381_v5 = vadd.f32 %v350_v3, %v349_v4 }
 0x1ba   :  { %353 = vrot.lane.b32.xlu0 %v1381_v5, %s1204_s4 }
 0x22c   :  { %v354_v31 = vpop.permute.xlu0 %353 }
 0x22d   :  { %356 = vst.msk [vmem:[#allocation3] sm:$0xff] %vm120_vm0, %v354_v31  ;;  %940 = vmatmul.mubr.msk.f32.vlgmr.msra.gmra.mxu0 %vm120_vm0, %v354_v31 }
 0x22e   :  { %687 = vmatpush1.msra.mxu0 %v1278_v8  ;;  %734 = vmatprep.mubr.f32.mxu0 %v1203_v0 }
 0x22f   :  { %688 = vmatprep.subr.mxu0 %v1280_v9 }
 0x230   :  { %689 = vmatpush1.msra.mxu0 %v1283_v11 }
 0x231   :  { %690 = vmatprep.subr.mxu0 %v1286_v13 }
 0x232   :  { %691 = vmatpush1.msra.mxu0 %v1288_v14 }
 0x233   :  { %692 = vmatprep.subr.mxu0 %v1291_v16 }
 0x234   :  { %v369_v8 = vld [vmem:[%s368_s16] sm:$0x1]  ;;  %693 = vmatpush1.msra.mxu0 %v1294_v18 }
 0x235   :  { %v388_v9 = vld [vmem:[%s387_s17] sm:$0x1]  ;;  %v373_v11 = vsel %vm372_vm1, %v369_v8, 0.0  ;;  %694 = vmatprep.subr.mxu0 %v1297_v20 }
 0x236   :  { %v392_v13 = vsel %vm391_vm2, %v388_v9, 0.0  ;;  %375 = vst.msk [vmem:[#allocation4] sm:$0x1] %vm374_vm3, %v373_v11  ;;  %695 = vmatpush1.msra.mxu0 %v1300_v22 }
 0x237   :  { %394 = vst.msk [vmem:[#allocation4 + $0x3] sm:$0x1] %vm393_vm4, %v392_v13  ;;  %696 = vmatprep.subr.mxu0 %v1303_v24 }
 0x238   :  { %697 = vmatpush1.msra.mxu0 %v1306_v26 }
 0x239   :  { %698 = vmatprep.subr.mxu0 %v1309_v28 }
 0x23a   :  { %699 = vmatpush1.msra.mxu0 %v1312_v30  ;;  %v397_v30 = vld [vmem:[#allocation2 + $0x18] sm:$0xff] }
 0x23b   :  { %700 = vmatprep.subr.mxu0 %v1315_v32 }
 0x23c   :  { %701 = vmatpush1.msra.mxu0 %v1318_v33 }
 0x2ed   :  { %v466_v14 = vpop.f32.mrf.mxu0 }
 0x2ee   :  { %v467_v16 = vadd.f32 %v466_v14, %v1367_v42  ;;  %v667_v14 = vld [vmem:[#allocation2 + $0x38] sm:$0xff] }
 0x2ef   :  { %v468_v24 = vpop.f32.mrf.mxu0 }
 0x2f0   :  { %v471_v18 = vadd.f32 %v467_v16, %v1385_v7  ;;  %v469_v26 = vadd.f32 %v468_v24, %v1371_v53 }
 0x2f2   :  { %v941_v20 = vmul.f32 -1.442695, %v471_v18 }
 0x2f4   :  { %1058 = vpow2.f32 %v941_v20  ;;  %v811_v20 = vld [vmem:[#allocation13 + $0x38] sm:$0xff] }
 0x301   :  { %v1059_v22 = vpop.eup %1058 }
 0x302   :  { %v475_v36 = vadd.f32 1.0, %v1059_v22  ;;  %v807_v22 = vld [vmem:[#allocation13 + $0x18] sm:$0xff] }
 0x304   :  { %1060 = vrcp.f32 %v475_v36 }
 0x311   :  { %v1061_v28 = vpop.eup %1060 }
 0x312   :  { %v478_v37 = vmul.f32 %v1061_v28, %v469_v26  ;;  %v481_v33 = vsub.f32 1.0, %v1061_v28  ;;  %v487_v40 = vmul.f32 %v1061_v28, %v1381_v5  ;;  %v806_v26 = vld [vmem:[#allocation13 + $0x10] sm:$0xff] }
 0x314   :  { %v479_v38 = vadd.f32 %v478_v37, %v397_v30  ;;  %v805_v30 = vld [vmem:[#allocation13 + $0x8] sm:$0xff] }
 0x316   :  { %1062 = vtanh.f32 %v479_v38 }
 0x323   :  { %v1063_v32 = vpop.eup %1062 }
 0x324   :  { %483 = vrot.lane.b32.xlu1 %v1063_v32, %s1204_s4  ;;  %v804_v32 = vld [vmem:[#allocation13] sm:$0xff] }
 0x396   :  { %v484_v39 = vpop.permute.xlu1 %483 }
 0x397   :  { %v486_v41 = vmul.f32 %v484_v39, %v481_v33 }
 0x399   :  { %v488_v43 = vadd.f32 %v487_v40, %v486_v41 }
 0x39b   :  { %490 = vrot.lane.b32.xlu1 %v488_v43, %s1204_s4 }
 0x40d   :  { %v491_v44 = vpop.permute.xlu1 %490 }
 0x40e   :  { %493 = vst.msk [vmem:[#allocation3] sm:$0xff] %vm120_vm0, %v491_v44  ;;  %958 = vmatmul.mubr.msk.f32.vlgmr.msra.gmra.mxu1 %vm120_vm0, %v491_v44 }
 0x40f   :  { %1021 = vmatpush3.msra.mxu1 %v811_v20  ;;  %1036 = vmatprep.mubr.msk.f32.mxu1 %vm1205_vm7, %v1203_v0 }
 0x410   :  { %1022 = vmatprep.subr.mxu1 %v1203_v0 }
 0x415   :  { %v506_v47 = vld [vmem:[%s505_s25] sm:$0x1] }
 0x416   :  { %v524_v48 = vld [vmem:[%s523_s26] sm:$0x1]  ;;  %v510_v49 = vsel %vm509_vm5, %v506_v47, 0.0 }
 0x417   :  { %v528_v50 = vsel %vm527_vm6, %v524_v48, 0.0  ;;  %511 = vst.msk [vmem:[#allocation4 + $0x1] sm:$0x1] %vm374_vm3, %v510_v49 }
 0x418   :  { %529 = vst.msk [vmem:[#allocation4 + $0x2] sm:$0x1] %vm393_vm4, %v528_v50 }
 0x4ce   :  { %v601_v51 = vpop.f32.mrf.mxu1 }
 0x4cf   :  { %v602_v52 = vadd.f32 %v601_v51, %v1367_v42 }
 0x4d0   :  { %v603_v58 = vpop.f32.mrf.mxu1 }
 0x4d1   :  { %v606_v54 = vadd.f32 %v602_v52, %v1388_v17  ;;  %v604_v59 = vadd.f32 %v603_v58, %v1371_v53 }
 0x4d3   :  { %v959_v55 = vmul.f32 -1.442695, %v606_v54 }
 0x4d5   :  { %1064 = vpow2.f32 %v959_v55 }
 0x4e2   :  { %v1065_v56 = vpop.eup %1064 }
 0x4e3   :  { %v610_v57 = vadd.f32 1.0, %v1065_v56 }
 0x4e5   :  { %1066 = vrcp.f32 %v610_v57 }
 0x4f2   :  { %v1067_v60 = vpop.eup %1066 }
 0x4f3   :  { %v613_v61 = vmul.f32 %v1067_v60, %v604_v59  ;;  %v616_v2 = vsub.f32 1.0, %v1067_v60  ;;  %v622_v4 = vmul.f32 %v1067_v60, %v488_v43 }
 0x4f5   :  { %v614_v63 = vadd.f32 %v613_v61, %v532_v62 }
 0x4f7   :  { %1068 = vtanh.f32 %v614_v63 }
 0x504   :  { %v1069_v1 = vpop.eup %1068 }
 0x505   :  { %618 = vrot.lane.b32.xlu0 %v1069_v1, %s1204_s4 }
 0x577   :  { %v619_v3 = vpop.permute.xlu0 %618 }
 0x578   :  { %v621_v5 = vmul.f32 %v619_v3, %v616_v2 }
 0x57a   :  { %v623_v6 = vadd.f32 %v622_v4, %v621_v5 }
 0x57c   :  { %625 = vrot.lane.b32.xlu1 %v623_v6, %s1204_s4 }
 0x5ee   :  { %v626_v7 = vpop.permute.xlu1 %625 }
 0x5ef   :  { %628 = vst.msk [vmem:[#allocation3] sm:$0xff] %vm120_vm0, %v626_v7  ;;  %976 = vmatmul.mubr.msk.f32.vlgmr.msra.gmra.mxu0 %vm120_vm0, %v626_v7 }
 0x5f6   :  { %v641_v10 = vld [vmem:[%s523_s26] sm:$0x1] }
 0x5f7   :  { %v659_v12 = vld [vmem:[%s505_s25] sm:$0x1]  ;;  %v645_v15 = vsel %vm527_vm6, %v641_v10, 0.0 }
 0x5f8   :  { %v663_v17 = vsel %vm509_vm5, %v659_v12, 0.0  ;;  %646 = vst.msk [vmem:[#allocation4 + $0x2] sm:$0x1] %vm374_vm3, %v645_v15 }
 0x5f9   :  { %664 = vst.msk [vmem:[#allocation4 + $0x1] sm:$0x1] %vm393_vm4, %v663_v17 }
 0x6af   :  { %v736_v19 = vpop.f32.mrf.mxu0 }
 0x6b0   :  { %v737_v21 = vadd.f32 %v736_v19, %v1367_v42  ;;  %v810_v42 = vld [vmem:[#allocation13 + $0x30] sm:$0xff] }
 0x6b1   :  { %v738_v8 = vpop.f32.mrf.mxu0  ;;  %1023 = vmatpush3.msra.mxu1 %v810_v42 }
 0x6b2   :  { %v741_v23 = vadd.f32 %v737_v21, %v1391_v25  ;;  %v739_v9 = vadd.f32 %v738_v8, %v1371_v53  ;;  %v809_v25 = vld [vmem:[#allocation13 + $0x28] sm:$0xff]  ;;  %1024 = vmatprep.subr.mxu1 %v1203_v0  ;;  %v808_v53 = vld [vmem:[#allocation13 + $0x20] sm:$0xff] }
 0x6b3   :  { %1025 = vmatpush3.msra.mxu1 %v809_v25 }
 0x6b4   :  { %v977_v27 = vmul.f32 -1.442695, %v741_v23  ;;  %1026 = vmatprep.subr.mxu1 %v1203_v0 }
 0x6b5   :  { %1027 = vmatpush3.msra.mxu1 %v808_v53 }
 0x6b6   :  { %1070 = vpow2.f32 %v977_v27  ;;  %1028 = vmatprep.subr.mxu1 %v1203_v0 }
 0x6b7   :  { %1029 = vmatpush3.msra.mxu1 %v807_v22 }
 0x6b8   :  { %1030 = vmatprep.subr.mxu1 %v1203_v0 }
 0x6b9   :  { %1031 = vmatpush3.msra.mxu1 %v806_v26 }
 0x6ba   :  { %1032 = vmatprep.subr.mxu1 %v1203_v0 }
 0x6bb   :  { %1033 = vmatpush3.msra.mxu1 %v805_v30 }
 0x6bc   :  { %1034 = vmatprep.subr.mxu1 %v1203_v0  ;;  %v993_v0 = vld [vmem:[%s1527_s7] ss:$0 sm:$0xff] }
 0x6bd   :  { %1035 = vmatpush3.msra.mxu1 %v804_v32 }
 0x6c3   :  { %v1071_v29 = vpop.eup %1070 }
 0x6c4   :  { %v745_v31 = vadd.f32 1.0, %v1071_v29 }
 0x6c6   :  { %1072 = vrcp.f32 %v745_v31 }
 0x6d3   :  { %v1073_v11 = vpop.eup %1072 }
 0x6d4   :  { %v748_v13 = vmul.f32 %v1073_v11, %v739_v9  ;;  %v751_v36 = vsub.f32 1.0, %v1073_v11  ;;  %v757_v28 = vmul.f32 %v1073_v11, %v623_v6 }
 0x6d6   :  { %v749_v16 = vadd.f32 %v748_v13, %v667_v14 }
 0x6d8   :  { %1074 = vtanh.f32 %v749_v16 }
 0x6e5   :  { %v1075_v18 = vpop.eup %1074 }
 0x6e6   :  { %753 = vrot.lane.b32.xlu0 %v1075_v18, %s1204_s4 }
 0x758   :  { %v754_v24 = vpop.permute.xlu0 %753 }
 0x759   :  { %v756_v37 = vmul.f32 %v754_v24, %v751_v36 }
 0x75b   :  { %v758_v38 = vadd.f32 %v757_v28, %v756_v37 }
 0x75d   :  { %760 = vrot.lane.b32.xlu1 %v758_v38, %s1204_s4 }
 0x7cf   :  { %v761_v33 = vpop.permute.xlu1 %760 }
 0x7d0   :  { %763 = vst.msk [vmem:[#allocation3] sm:$0xff] %vm120_vm0, %v761_v33 }
 0x7d7   :  { %v776_v39 = vld [vmem:[%s387_s17] sm:$0x1] }
 0x7d8   :  { %v794_v40 = vld [vmem:[%s368_s16] sm:$0x1]  ;;  %v780_v41 = vsel %vm391_vm2, %v776_v39, 0.0 }
 0x7d9   :  { %v798_v43 = vsel %vm372_vm1, %v794_v40, 0.0  ;;  %781 = vst.msk [vmem:[#allocation4 + $0x3] sm:$0x1] %vm374_vm3, %v780_v41 }
 0x7da   :  { %799 = vst.msk [vmem:[#allocation4] sm:$0x1] %vm393_vm4, %v798_v43 }
 0x7e1   :  { %v803_v44 = vld [vmem:[#allocation4] sm:$0xf] }
 0x7e2   :  { %1037 = vmatmul.mubr.msk.f32.vlgmr.msra.gmra.mxu1 %vm120_vm0, %v803_v44 }
 0x8a2   :  { %v890_v45 = vpop.f32.mrf.mxu1 }
 0x8a3   :  { %v891_v46 = vadd.f32 %v993_v0, %v890_v45 }
 0x8a4   :  { %v1038_v35 = vpop.f32.mrf.mxu1 }
 0x8a5   :  { %894 = vst [vmem:[#allocation15] sm:$0xf] %v891_v46 }
 0x8a6   :  { %1175 = shalt.err (!%p1172_p2)
}
 0x8a7   :  { %904 = dma.vmem_to_hbm [thread:$0]  %s902_s3, 64, %s1528_s8, [#allocation9]  }
 0x8a8   :  { %1192 = dma.done.wait [#allocation9], 64  }
 0x8a9   :  { %1193 = vsyncadd [#allocation9], 4294967232 }
 0x8aa   :  { %908 = vsyncpa [#allocation8], 1 }
 0x8ab   :  { %909 = vsyncpa [#allocation11], 1 }
 0x8ac   :  { %910 = vsyncpa [#allocation14], 1 }
 0x8ad   :  { %911 = vsyncpa [#allocation9], 1 }

</bundles_post_ra>
